<compile_context>
chip_gen: v7x
topology: tpu7x:2x2x1
jax: 0.10.0
libtpu: 0.0.40
codegen_flags: <defaults>
</compile_context>

<pallas_src>
import jax
import jax.numpy as jnp
from jax import lax
from jax.experimental import pallas as pl
from jax.experimental.pallas import tpu as pltpu

B, S, E, H, V = 2, 8, 32, 32, 128
BS = B * S
RSEL = 8                    # sublane-aligned rows holding the B*B scores
SEL2 = 2 * RSEL
COS_EPS = 1e-8              # F.cosine_similarity default eps
COS_EPS2 = COS_EPS * COS_EPS


def align_kernel(ids_sm, fl_sm, nl_sm, start_sm, stop_sm,
                 w_ref, wv_ref, out_ref):
    p = pl.program_id(0)

    # ---- fused embedding "gather" + hidden projection (one MXU matmul) ----
    # emb_table @ W_h is folded wrapper-side into w_ref ([V,H]).
    row_bs = lax.broadcasted_iota(jnp.int32, (BS, 1), 0)               # [BS,1]
    ids_col = jnp.zeros((BS, 1), jnp.int32)
    for r in range(BS):                                                # SMEM scalar reads
        ids_col = jnp.where(row_bs == r, ids_sm[p, r], ids_col)
    vocab_iota = lax.broadcasted_iota(jnp.int32, (BS, V), 1)           # [BS,V]
    onehot = (vocab_iota == ids_col).astype(jnp.float32)               # [BS,V]
    # TODO(synk): at real vocab sizes replace the one-hot matmul with a DMA row
    # gather (pl.Element BlockSpec / make_async_copy) and tile V on the grid.
    hidden = jnp.tanh(jnp.dot(onehot, w_ref[...],
                              preferred_element_type=jnp.float32))     # [BS,H]

    # ---- certainty: exp(mean over window of max_v log_softmax(logits)) ----
    # max_v log_softmax(x) == -log(sum exp(x - max(x)))
    # TODO(synk): at real LM sizes select the window rows of `hidden` BEFORE
    # the vocab matmul so the [*,V] work scales with window length, not BS.
    logits = jnp.dot(hidden, wv_ref[...],
                     preferred_element_type=jnp.float32)               # [BS,V]
    m = jnp.max(logits, axis=-1, keepdims=True)                        # [BS,1]
    mtp = -jnp.log(jnp.sum(jnp.exp(logits - m), axis=-1, keepdims=True))
    certainty = jnp.zeros((1, 1), jnp.float32)
    for b in range(B):                                   # masked VPU/XLU reduce
        lo = start_sm[p, b] + b * S
        hi = stop_sm[p, b] + b * S
        winf = ((row_bs >= lo) & (row_bs < hi)).astype(jnp.float32)    # [BS,1]
        cnt = jnp.maximum(jnp.sum(winf, axis=0, keepdims=True), 1.0)   # [1,1]
        s_b = jnp.sum(mtp * winf, axis=0, keepdims=True)               # [1,1]
        certainty = certainty + jnp.exp(s_b / cnt)
    certainty = certainty * (1.0 / B)                                  # [1,1]

    # ---- cosine similarity with PyTorch advanced-indexing broadcast ----
    # rows 0..RSEL-1 pick hidden[b, fl_idx[j]]; rows RSEL.. pick nl_idx[j];
    # selection one-hot built in-kernel from SMEM scalars, applied on the MXU.
    rows_sel = lax.broadcasted_iota(jnp.int32, (SEL2, 1), 0)           # [2R,1]
    cols_sel = lax.broadcasted_iota(jnp.int32, (SEL2, BS), 1)          # [2R,BS]
    tgt = jnp.full((SEL2, 1), -1, jnp.int32)
    for b in range(B):
        for j in range(B):
            r = b * B + j
            tgt = jnp.where(rows_sel == r, b * S + fl_sm[p, j], tgt)
            tgt = jnp.where(rows_sel == (RSEL + r), b * S + nl_sm[p, j], tgt)
    sel = (cols_sel == tgt).astype(jnp.float32)                        # [2R,BS]
    selected = jnp.dot(sel, hidden, preferred_element_type=jnp.float32)  # [2R,H]
    fl = selected[:RSEL, :]
    nl = selected[RSEL:, :]
    num = jnp.sum(fl * nl, axis=-1, keepdims=True)                     # [R,1]
    nf2 = jnp.sum(fl * fl, axis=-1, keepdims=True)
    nn2 = jnp.sum(nl * nl, axis=-1, keepdims=True)
    # max(||x||^2, eps^2) == max(||x||, eps)^2 -> single rsqrt on the EUP.
    inv = lax.rsqrt(jnp.maximum(nf2, COS_EPS2) * jnp.maximum(nn2, COS_EPS2))
    sim = num * inv                                                    # [R,1]

    # lane-dense [8,128] store (unmasked vst); wrapper slices column 0.
    out_ref[...] = jnp.broadcast_to((sim + certainty) * 0.5, out_ref.shape)


def formal_align_forward_batch(input_ids, attention_mask, input_length,
                               emb_table, w_h, w_v):
    """Scores P independent (B,S) problems with ONE pallas_call (grid=(P,))."""
    P = input_ids.shape[0]
    assert input_ids.shape == (P, B, S) and B * B <= RSEL

    # ---- index plumbing (wrapper-side; lands in SMEM via scalar prefetch) ----
    fl_idx = jnp.sum(attention_mask, axis=2).astype(jnp.int32) - 1     # [P,B]
    nl_idx = input_length[:, :, 0].astype(jnp.int32) - 3               # [P,B]
    fl_w = jnp.mod(fl_idx, S)     # wrap negatives like PyTorch advanced indexing
    nl_w = jnp.mod(nl_idx, S)
    start = nl_idx + 1            # certainty window [start, stop), no wrap
    stop = fl_idx
    ids_flat = input_ids.reshape(P, BS).astype(jnp.int32)

    # fold emb_table @ W_h (static weights): one fewer in-kernel matmul + DMA
    tab_wh = jnp.dot(emb_table, w_h).astype(jnp.float32)               # [V,H]

    grid_spec = pltpu.PrefetchScalarGridSpec(
        num_scalar_prefetch=5,
        grid=(P,),
        in_specs=[
            # constant index maps -> weights stay VMEM-resident across problems
            pl.BlockSpec((V, H), lambda p, *_: (0, 0)),
            pl.BlockSpec((H, V), lambda p, *_: (0, 0)),
        ],
        out_specs=pl.BlockSpec((RSEL, 128), lambda p, *_: (p, 0)),
    )
    padded = pl.pallas_call(
        align_kernel,
        out_shape=jax.ShapeDtypeStruct((P * RSEL, 128), jnp.float32),
        grid_spec=grid_spec,
        compiler_params=pltpu.CompilerParams(
            dimension_semantics=("parallel",)),
        # TODO(synk): when the synthetic LM becomes a real tiled model, set
        # vmem_limit_bytes against v7x's 32 MiB scoped / 64 MiB physical VMEM
        # and cast matmul operands to bf16 on v6e/v7x.
    )(ids_flat, fl_w, nl_w, start, stop, tab_wh, w_v)
    return padded.reshape(P, RSEL, 128)[:, :B * B, 0].reshape(P, B, B)


def formal_align_forward(input_ids, attention_mask, input_length,
                         emb_table, w_h, w_v):
    """Single-problem forward matching FormalAlignModel.forward semantics."""
    return formal_align_forward_batch(
        input_ids[None], attention_mask[None], input_length[None],
        emb_table, w_h, w_v)[0]


def reference(input_ids, attention_mask, input_length, emb_table, w_h, w_v):
    """Plain-JAX mirror of the PyTorch alignment_score (for validation)."""
    emb = emb_table[input_ids]                                         # [B,S,E]
    hidden = jnp.tanh(emb @ w_h)
    logits = hidden @ w_v
    nl_index = input_length[:, 0] - 3
    fl_index = jnp.sum(attention_mask, axis=1) - 1
    bsz = logits.shape[0]
    certainty = 0.0
    for bi in range(bsz):
        start = int(nl_index[bi]) + 1
        stop = int(fl_index[bi])
        lp = jax.nn.log_softmax(logits[bi, start:stop], axis=-1)
        certainty = certainty + jnp.exp(jnp.mean(jnp.max(lp, axis=-1))) / bsz
    fl_state = hidden[:, fl_index]   # [B,B,H] — PyTorch advanced-indexing broadcast
    nl_state = hidden[:, nl_index]
    num = jnp.sum(fl_state * nl_state, axis=-1)
    den = (jnp.maximum(jnp.linalg.norm(fl_state, axis=-1), COS_EPS)
           * jnp.maximum(jnp.linalg.norm(nl_state, axis=-1), COS_EPS))
    sim = num / den
    return (sim + certainty) / 2


if __name__ == "__main__":
    key = jax.random.PRNGKey(0)
    k_ids, k_tab, k_wh, k_wv = jax.random.split(key, 4)

    # deterministic synthetic "model" parameters
    emb_table = jax.random.normal(k_tab, (V, E), dtype=jnp.float32) * 0.02
    w_h = jax.random.normal(k_wh, (E, H), dtype=jnp.float32) * 0.1
    w_v = jax.random.normal(k_wv, (H, V), dtype=jnp.float32) * 0.1

    # P independent scoring problems, amortized behind one pallas_call grid
    P = 3
    input_ids = jax.random.randint(k_ids, (P, B, S), 0, V, dtype=jnp.int32)
    pos = jnp.arange(S, dtype=jnp.int32)[None, :]
    lens = jnp.array([[8, 8], [7, 8], [6, 7]], dtype=jnp.int32)        # [P,B]
    attention_mask = (pos[None, :, :] < lens[:, :, None]).astype(jnp.int32)
    input_length = jnp.array([[[6], [7]], [[5], [6]], [[4], [5]]],
                             dtype=jnp.int32)                          # [P,B,1]

    out = formal_align_forward_batch(input_ids, attention_mask, input_length,
                                     emb_table, w_h, w_v)
    out = jax.block_until_ready(out)
    assert out.shape == (P, B, B)

    for pi in range(P):
        ref = reference(input_ids[pi], attention_mask[pi], input_length[pi],
                        emb_table, w_h, w_v)
        assert jnp.allclose(out[pi], ref, atol=1e-4, rtol=1e-4), (pi, out[pi], ref)

    # single-problem entry point (same semantics as FormalAlignModel.forward)
    out1 = formal_align_forward(input_ids[0], attention_mask[0],
                                input_length[0], emb_table, w_h, w_v)
    out1 = jax.block_until_ready(out1)
    assert jnp.allclose(out1, out[0], atol=1e-5, rtol=1e-5)

    print("KERNEL_OK")
</pallas_src>

<mosaic_0001>
module attributes {stable_mosaic.version = 11 : i64} {
  func.func @align_kernel(%arg0: i32, %arg1: memref<3x16xi32, #tpu.memory_space<smem>>, %arg2: memref<3x2xi32, #tpu.memory_space<smem>>, %arg3: memref<3x2xi32, #tpu.memory_space<smem>>, %arg4: memref<3x2xi32, #tpu.memory_space<smem>>, %arg5: memref<3x2xi32, #tpu.memory_space<smem>>, %arg6: memref<128x32xf32, #tpu.memory_space<vmem>>, %arg7: memref<32x128xf32, #tpu.memory_space<vmem>>, %arg8: memref<8x128xf32, #tpu.memory_space<vmem>>) attributes {dimension_semantics = [#tpu.dimension_semantics<parallel>], iteration_bounds = array<i64: 3>, scalar_prefetch = 5 : i64, scratch_operands = 0 : i64, tpu.core_type = #tpu.core_type<tc>, window_params = [{pipeline_mode = #tpu.pipeline_mode<synchronous>, transform_indices = @transform_0, window_bounds = array<i64: 128, 32>}, {pipeline_mode = #tpu.pipeline_mode<synchronous>, transform_indices = @transform_1, window_bounds = array<i64: 32, 128>}, {transform_indices = @transform_2, window_bounds = array<i64: 8, 128>}]} {
    %0 = tpu.iota {dimensions = array<i32: 0>} : vector<16x1xi32>
    %c0_i32 = arith.constant 0 : i32
    %1 = vector.broadcast %c0_i32 : i32 to vector<16x1xi32>
    %c0_i32_0 = arith.constant 0 : i32
    %2 = vector.broadcast %c0_i32_0 : i32 to vector<16x1xi32>
    %3 = arith.cmpi eq, %0, %2 : vector<16x1xi32>
    %4 = arith.index_cast %arg0 : i32 to index
    %c0 = arith.constant 0 : index
    %5 = memref.load %arg1[%4, %c0] : memref<3x16xi32, #tpu.memory_space<smem>>
    %6 = vector.broadcast %5 : i32 to vector<16x1xi32>
    %7 = arith.select %3, %6, %1 : vector<16x1xi1>, vector<16x1xi32>
    %c1_i32 = arith.constant 1 : i32
    %8 = vector.broadcast %c1_i32 : i32 to vector<16x1xi32>
    %9 = arith.cmpi eq, %0, %8 : vector<16x1xi32>
    %10 = arith.index_cast %arg0 : i32 to index
    %c1 = arith.constant 1 : index
    %11 = memref.load %arg1[%10, %c1] : memref<3x16xi32, #tpu.memory_space<smem>>
    %12 = vector.broadcast %11 : i32 to vector<16x1xi32>
    %13 = arith.select %9, %12, %7 : vector<16x1xi1>, vector<16x1xi32>
    %c2_i32 = arith.constant 2 : i32
    %14 = vector.broadcast %c2_i32 : i32 to vector<16x1xi32>
    %15 = arith.cmpi eq, %0, %14 : vector<16x1xi32>
    %16 = arith.index_cast %arg0 : i32 to index
    %c2 = arith.constant 2 : index
    %17 = memref.load %arg1[%16, %c2] : memref<3x16xi32, #tpu.memory_space<smem>>
    %18 = vector.broadcast %17 : i32 to vector<16x1xi32>
    %19 = arith.select %15, %18, %13 : vector<16x1xi1>, vector<16x1xi32>
    %c3_i32 = arith.constant 3 : i32
    %20 = vector.broadcast %c3_i32 : i32 to vector<16x1xi32>
    %21 = arith.cmpi eq, %0, %20 : vector<16x1xi32>
    %22 = arith.index_cast %arg0 : i32 to index
    %c3 = arith.constant 3 : index
    %23 = memref.load %arg1[%22, %c3] : memref<3x16xi32, #tpu.memory_space<smem>>
    %24 = vector.broadcast %23 : i32 to vector<16x1xi32>
    %25 = arith.select %21, %24, %19 : vector<16x1xi1>, vector<16x1xi32>
    %c4_i32 = arith.constant 4 : i32
    %26 = vector.broadcast %c4_i32 : i32 to vector<16x1xi32>
    %27 = arith.cmpi eq, %0, %26 : vector<16x1xi32>
    %28 = arith.index_cast %arg0 : i32 to index
    %c4 = arith.constant 4 : index
    %29 = memref.load %arg1[%28, %c4] : memref<3x16xi32, #tpu.memory_space<smem>>
    %30 = vector.broadcast %29 : i32 to vector<16x1xi32>
    %31 = arith.select %27, %30, %25 : vector<16x1xi1>, vector<16x1xi32>
    %c5_i32 = arith.constant 5 : i32
    %32 = vector.broadcast %c5_i32 : i32 to vector<16x1xi32>
    %33 = arith.cmpi eq, %0, %32 : vector<16x1xi32>
    %34 = arith.index_cast %arg0 : i32 to index
    %c5 = arith.constant 5 : index
    %35 = memref.load %arg1[%34, %c5] : memref<3x16xi32, #tpu.memory_space<smem>>
    %36 = vector.broadcast %35 : i32 to vector<16x1xi32>
    %37 = arith.select %33, %36, %31 : vector<16x1xi1>, vector<16x1xi32>
    %c6_i32 = arith.constant 6 : i32
    %38 = vector.broadcast %c6_i32 : i32 to vector<16x1xi32>
    %39 = arith.cmpi eq, %0, %38 : vector<16x1xi32>
    %40 = arith.index_cast %arg0 : i32 to index
    %c6 = arith.constant 6 : index
    %41 = memref.load %arg1[%40, %c6] : memref<3x16xi32, #tpu.memory_space<smem>>
    %42 = vector.broadcast %41 : i32 to vector<16x1xi32>
    %43 = arith.select %39, %42, %37 : vector<16x1xi1>, vector<16x1xi32>
    %c7_i32 = arith.constant 7 : i32
    %44 = vector.broadcast %c7_i32 : i32 to vector<16x1xi32>
    %45 = arith.cmpi eq, %0, %44 : vector<16x1xi32>
    %46 = arith.index_cast %arg0 : i32 to index
    %c7 = arith.constant 7 : index
    %47 = memref.load %arg1[%46, %c7] : memref<3x16xi32, #tpu.memory_space<smem>>
    %48 = vector.broadcast %47 : i32 to vector<16x1xi32>
    %49 = arith.select %45, %48, %43 : vector<16x1xi1>, vector<16x1xi32>
    %c8_i32 = arith.constant 8 : i32
    %50 = vector.broadcast %c8_i32 : i32 to vector<16x1xi32>
    %51 = arith.cmpi eq, %0, %50 : vector<16x1xi32>
    %52 = arith.index_cast %arg0 : i32 to index
    %c8 = arith.constant 8 : index
    %53 = memref.load %arg1[%52, %c8] : memref<3x16xi32, #tpu.memory_space<smem>>
    %54 = vector.broadcast %53 : i32 to vector<16x1xi32>
    %55 = arith.select %51, %54, %49 : vector<16x1xi1>, vector<16x1xi32>
    %c9_i32 = arith.constant 9 : i32
    %56 = vector.broadcast %c9_i32 : i32 to vector<16x1xi32>
    %57 = arith.cmpi eq, %0, %56 : vector<16x1xi32>
    %58 = arith.index_cast %arg0 : i32 to index
    %c9 = arith.constant 9 : index
    %59 = memref.load %arg1[%58, %c9] : memref<3x16xi32, #tpu.memory_space<smem>>
    %60 = vector.broadcast %59 : i32 to vector<16x1xi32>
    %61 = arith.select %57, %60, %55 : vector<16x1xi1>, vector<16x1xi32>
    %c10_i32 = arith.constant 10 : i32
    %62 = vector.broadcast %c10_i32 : i32 to vector<16x1xi32>
    %63 = arith.cmpi eq, %0, %62 : vector<16x1xi32>
    %64 = arith.index_cast %arg0 : i32 to index
    %c10 = arith.constant 10 : index
    %65 = memref.load %arg1[%64, %c10] : memref<3x16xi32, #tpu.memory_space<smem>>
    %66 = vector.broadcast %65 : i32 to vector<16x1xi32>
    %67 = arith.select %63, %66, %61 : vector<16x1xi1>, vector<16x1xi32>
    %c11_i32 = arith.constant 11 : i32
    %68 = vector.broadcast %c11_i32 : i32 to vector<16x1xi32>
    %69 = arith.cmpi eq, %0, %68 : vector<16x1xi32>
    %70 = arith.index_cast %arg0 : i32 to index
    %c11 = arith.constant 11 : index
    %71 = memref.load %arg1[%70, %c11] : memref<3x16xi32, #tpu.memory_space<smem>>
    %72 = vector.broadcast %71 : i32 to vector<16x1xi32>
    %73 = arith.select %69, %72, %67 : vector<16x1xi1>, vector<16x1xi32>
    %c12_i32 = arith.constant 12 : i32
    %74 = vector.broadcast %c12_i32 : i32 to vector<16x1xi32>
    %75 = arith.cmpi eq, %0, %74 : vector<16x1xi32>
    %76 = arith.index_cast %arg0 : i32 to index
    %c12 = arith.constant 12 : index
    %77 = memref.load %arg1[%76, %c12] : memref<3x16xi32, #tpu.memory_space<smem>>
    %78 = vector.broadcast %77 : i32 to vector<16x1xi32>
    %79 = arith.select %75, %78, %73 : vector<16x1xi1>, vector<16x1xi32>
    %c13_i32 = arith.constant 13 : i32
    %80 = vector.broadcast %c13_i32 : i32 to vector<16x1xi32>
    %81 = arith.cmpi eq, %0, %80 : vector<16x1xi32>
    %82 = arith.index_cast %arg0 : i32 to index
    %c13 = arith.constant 13 : index
    %83 = memref.load %arg1[%82, %c13] : memref<3x16xi32, #tpu.memory_space<smem>>
    %84 = vector.broadcast %83 : i32 to vector<16x1xi32>
    %85 = arith.select %81, %84, %79 : vector<16x1xi1>, vector<16x1xi32>
    %c14_i32 = arith.constant 14 : i32
    %86 = vector.broadcast %c14_i32 : i32 to vector<16x1xi32>
    %87 = arith.cmpi eq, %0, %86 : vector<16x1xi32>
    %88 = arith.index_cast %arg0 : i32 to index
    %c14 = arith.constant 14 : index
    %89 = memref.load %arg1[%88, %c14] : memref<3x16xi32, #tpu.memory_space<smem>>
    %90 = vector.broadcast %89 : i32 to vector<16x1xi32>
    %91 = arith.select %87, %90, %85 : vector<16x1xi1>, vector<16x1xi32>
    %c15_i32 = arith.constant 15 : i32
    %92 = vector.broadcast %c15_i32 : i32 to vector<16x1xi32>
    %93 = arith.cmpi eq, %0, %92 : vector<16x1xi32>
    %94 = arith.index_cast %arg0 : i32 to index
    %c15 = arith.constant 15 : index
    %95 = memref.load %arg1[%94, %c15] : memref<3x16xi32, #tpu.memory_space<smem>>
    %96 = vector.broadcast %95 : i32 to vector<16x1xi32>
    %97 = arith.select %93, %96, %91 : vector<16x1xi1>, vector<16x1xi32>
    %98 = tpu.iota {dimensions = array<i32: 1>} : vector<16x128xi32>
    %99 = vector.broadcast %97 : vector<16x1xi32> to vector<16x128xi32>
    %100 = arith.cmpi eq, %98, %99 : vector<16x128xi32>
    %101 = arith.extui %100 : vector<16x128xi1> to vector<16x128xi32>
    %102 = arith.sitofp %101 : vector<16x128xi32> to vector<16x128xf32>
    %c0_1 = arith.constant 0 : index
    %c0_2 = arith.constant 0 : index
    %103 = vector.load %arg6[%c0_1, %c0_2] : memref<128x32xf32, #tpu.memory_space<vmem>>, vector<128x32xf32>
    %cst = arith.constant dense<0.000000e+00> : vector<16x32xf32>
    %104 = tpu.matmul %102, %103, %cst {dimension_numbers = #tpu.dot_dimension_numbers<[1], [0], [0], [1], [0, 0, 1, 1], [], []>} : vector<16x128xf32>, vector<128x32xf32>, vector<16x32xf32> -> vector<16x32xf32>
    %105 = math.tanh %104 : vector<16x32xf32>
    %c0_3 = arith.constant 0 : index
    %c0_4 = arith.constant 0 : index
    %106 = vector.load %arg7[%c0_3, %c0_4] : memref<32x128xf32, #tpu.memory_space<vmem>>, vector<32x128xf32>
    %cst_5 = arith.constant dense<0.000000e+00> : vector<16x128xf32>
    %107 = tpu.matmul %105, %106, %cst_5 {dimension_numbers = #tpu.dot_dimension_numbers<[1], [0], [0], [1], [0, 0, 1, 1], [], []>} : vector<16x32xf32>, vector<32x128xf32>, vector<16x128xf32> -> vector<16x128xf32>
    %cst_6 = arith.constant dense<0xFF800000> : vector<16xf32>
    %108 = vector.multi_reduction <maximumf>, %107, %cst_6 [1] : vector<16x128xf32> to vector<16xf32>
    %109 = vector.shape_cast %108 : vector<16xf32> to vector<16x1xf32>
    %110 = vector.broadcast %109 : vector<16x1xf32> to vector<16x128xf32>
    %111 = arith.subf %107, %110 : vector<16x128xf32>
    %112 = math.exp %111 : vector<16x128xf32>
    %cst_7 = arith.constant dense<0.000000e+00> : vector<16xf32>
    %113 = vector.multi_reduction <add>, %112, %cst_7 [1] : vector<16x128xf32> to vector<16xf32>
    %114 = vector.shape_cast %113 : vector<16xf32> to vector<16x1xf32>
    %115 = math.log %114 : vector<16x1xf32>
    %cst_8 = arith.constant 0.000000e+00 : f32
    %116 = vector.broadcast %cst_8 : f32 to vector<16x1xf32>
    %117 = arith.subf %116, %115 : vector<16x1xf32>
    %cst_9 = arith.constant 0.000000e+00 : f32
    %118 = vector.broadcast %cst_9 : f32 to vector<1x1xf32>
    %119 = arith.index_cast %arg0 : i32 to index
    %c0_10 = arith.constant 0 : index
    %120 = memref.load %arg4[%119, %c0_10] : memref<3x2xi32, #tpu.memory_space<smem>>
    %c0_i32_11 = arith.constant 0 : i32
    %121 = arith.addi %120, %c0_i32_11 : i32
    %122 = arith.index_cast %arg0 : i32 to index
    %c0_12 = arith.constant 0 : index
    %123 = memref.load %arg5[%122, %c0_12] : memref<3x2xi32, #tpu.memory_space<smem>>
    %c0_i32_13 = arith.constant 0 : i32
    %124 = arith.addi %123, %c0_i32_13 : i32
    %125 = vector.broadcast %121 : i32 to vector<16x1xi32>
    %126 = arith.cmpi sge, %0, %125 : vector<16x1xi32>
    %127 = vector.broadcast %124 : i32 to vector<16x1xi32>
    %128 = arith.cmpi slt, %0, %127 : vector<16x1xi32>
    %129 = arith.andi %126, %128 : vector<16x1xi1>
    %130 = arith.extui %129 : vector<16x1xi1> to vector<16x1xi32>
    %131 = arith.sitofp %130 : vector<16x1xi32> to vector<16x1xf32>
    %cst_14 = arith.constant dense<0.000000e+00> : vector<1xf32>
    %132 = vector.multi_reduction <add>, %131, %cst_14 [0] : vector<16x1xf32> to vector<1xf32>
    %133 = vector.shape_cast %132 : vector<1xf32> to vector<1x1xf32>
    %cst_15 = arith.constant 1.000000e+00 : f32
    %134 = vector.broadcast %cst_15 : f32 to vector<1x1xf32>
    %135 = arith.maximumf %133, %134 : vector<1x1xf32>
    %136 = arith.mulf %117, %131 : vector<16x1xf32>
    %cst_16 = arith.constant dense<0.000000e+00> : vector<1xf32>
    %137 = vector.multi_reduction <add>, %136, %cst_16 [0] : vector<16x1xf32> to vector<1xf32>
    %138 = vector.shape_cast %137 : vector<1xf32> to vector<1x1xf32>
    %139 = arith.divf %138, %135 : vector<1x1xf32>
    %140 = math.exp %139 : vector<1x1xf32>
    %141 = arith.addf %118, %140 : vector<1x1xf32>
    %142 = arith.index_cast %arg0 : i32 to index
    %c1_17 = arith.constant 1 : index
    %143 = memref.load %arg4[%142, %c1_17] : memref<3x2xi32, #tpu.memory_space<smem>>
    %c8_i32_18 = arith.constant 8 : i32
    %144 = arith.addi %143, %c8_i32_18 : i32
    %145 = arith.index_cast %arg0 : i32 to index
    %c1_19 = arith.constant 1 : index
    %146 = memref.load %arg5[%145, %c1_19] : memref<3x2xi32, #tpu.memory_space<smem>>
    %c8_i32_20 = arith.constant 8 : i32
    %147 = arith.addi %146, %c8_i32_20 : i32
    %148 = vector.broadcast %144 : i32 to vector<16x1xi32>
    %149 = arith.cmpi sge, %0, %148 : vector<16x1xi32>
    %150 = vector.broadcast %147 : i32 to vector<16x1xi32>
    %151 = arith.cmpi slt, %0, %150 : vector<16x1xi32>
    %152 = arith.andi %149, %151 : vector<16x1xi1>
    %153 = arith.extui %152 : vector<16x1xi1> to vector<16x1xi32>
    %154 = arith.sitofp %153 : vector<16x1xi32> to vector<16x1xf32>
    %cst_21 = arith.constant dense<0.000000e+00> : vector<1xf32>
    %155 = vector.multi_reduction <add>, %154, %cst_21 [0] : vector<16x1xf32> to vector<1xf32>
    %156 = vector.shape_cast %155 : vector<1xf32> to vector<1x1xf32>
    %cst_22 = arith.constant 1.000000e+00 : f32
    %157 = vector.broadcast %cst_22 : f32 to vector<1x1xf32>
    %158 = arith.maximumf %156, %157 : vector<1x1xf32>
    %159 = arith.mulf %117, %154 : vector<16x1xf32>
    %cst_23 = arith.constant dense<0.000000e+00> : vector<1xf32>
    %160 = vector.multi_reduction <add>, %159, %cst_23 [0] : vector<16x1xf32> to vector<1xf32>
    %161 = vector.shape_cast %160 : vector<1xf32> to vector<1x1xf32>
    %162 = arith.divf %161, %158 : vector<1x1xf32>
    %163 = math.exp %162 : vector<1x1xf32>
    %164 = arith.addf %141, %163 : vector<1x1xf32>
    %cst_24 = arith.constant 5.000000e-01 : f32
    %165 = vector.broadcast %cst_24 : f32 to vector<1x1xf32>
    %166 = arith.mulf %164, %165 : vector<1x1xf32>
    %167 = tpu.iota {dimensions = array<i32: 0>} : vector<16x1xi32>
    %168 = tpu.iota {dimensions = array<i32: 1>} : vector<16x16xi32>
    %c-1_i32 = arith.constant -1 : i32
    %169 = vector.broadcast %c-1_i32 : i32 to vector<16x1xi32>
    %c0_i32_25 = arith.constant 0 : i32
    %170 = vector.broadcast %c0_i32_25 : i32 to vector<16x1xi32>
    %171 = arith.cmpi eq, %167, %170 : vector<16x1xi32>
    %172 = arith.index_cast %arg0 : i32 to index
    %c0_26 = arith.constant 0 : index
    %173 = memref.load %arg2[%172, %c0_26] : memref<3x2xi32, #tpu.memory_space<smem>>
    %c0_i32_27 = arith.constant 0 : i32
    %174 = arith.addi %c0_i32_27, %173 : i32
    %175 = vector.broadcast %174 : i32 to vector<16x1xi32>
    %176 = arith.select %171, %175, %169 : vector<16x1xi1>, vector<16x1xi32>
    %c8_i32_28 = arith.constant 8 : i32
    %177 = vector.broadcast %c8_i32_28 : i32 to vector<16x1xi32>
    %178 = arith.cmpi eq, %167, %177 : vector<16x1xi32>
    %179 = arith.index_cast %arg0 : i32 to index
    %c0_29 = arith.constant 0 : index
    %180 = memref.load %arg3[%179, %c0_29] : memref<3x2xi32, #tpu.memory_space<smem>>
    %c0_i32_30 = arith.constant 0 : i32
    %181 = arith.addi %c0_i32_30, %180 : i32
    %182 = vector.broadcast %181 : i32 to vector<16x1xi32>
    %183 = arith.select %178, %182, %176 : vector<16x1xi1>, vector<16x1xi32>
    %c1_i32_31 = arith.constant 1 : i32
    %184 = vector.broadcast %c1_i32_31 : i32 to vector<16x1xi32>
    %185 = arith.cmpi eq, %167, %184 : vector<16x1xi32>
    %186 = arith.index_cast %arg0 : i32 to index
    %c1_32 = arith.constant 1 : index
    %187 = memref.load %arg2[%186, %c1_32] : memref<3x2xi32, #tpu.memory_space<smem>>
    %c0_i32_33 = arith.constant 0 : i32
    %188 = arith.addi %c0_i32_33, %187 : i32
    %189 = vector.broadcast %188 : i32 to vector<16x1xi32>
    %190 = arith.select %185, %189, %183 : vector<16x1xi1>, vector<16x1xi32>
    %c9_i32_34 = arith.constant 9 : i32
    %191 = vector.broadcast %c9_i32_34 : i32 to vector<16x1xi32>
    %192 = arith.cmpi eq, %167, %191 : vector<16x1xi32>
    %193 = arith.index_cast %arg0 : i32 to index
    %c1_35 = arith.constant 1 : index
    %194 = memref.load %arg3[%193, %c1_35] : memref<3x2xi32, #tpu.memory_space<smem>>
    %c0_i32_36 = arith.constant 0 : i32
    %195 = arith.addi %c0_i32_36, %194 : i32
    %196 = vector.broadcast %195 : i32 to vector<16x1xi32>
    %197 = arith.select %192, %196, %190 : vector<16x1xi1>, vector<16x1xi32>
    %c2_i32_37 = arith.constant 2 : i32
    %198 = vector.broadcast %c2_i32_37 : i32 to vector<16x1xi32>
    %199 = arith.cmpi eq, %167, %198 : vector<16x1xi32>
    %200 = arith.index_cast %arg0 : i32 to index
    %c0_38 = arith.constant 0 : index
    %201 = memref.load %arg2[%200, %c0_38] : memref<3x2xi32, #tpu.memory_space<smem>>
    %c8_i32_39 = arith.constant 8 : i32
    %202 = arith.addi %c8_i32_39, %201 : i32
    %203 = vector.broadcast %202 : i32 to vector<16x1xi32>
    %204 = arith.select %199, %203, %197 : vector<16x1xi1>, vector<16x1xi32>
    %c10_i32_40 = arith.constant 10 : i32
    %205 = vector.broadcast %c10_i32_40 : i32 to vector<16x1xi32>
    %206 = arith.cmpi eq, %167, %205 : vector<16x1xi32>
    %207 = arith.index_cast %arg0 : i32 to index
    %c0_41 = arith.constant 0 : index
    %208 = memref.load %arg3[%207, %c0_41] : memref<3x2xi32, #tpu.memory_space<smem>>
    %c8_i32_42 = arith.constant 8 : i32
    %209 = arith.addi %c8_i32_42, %208 : i32
    %210 = vector.broadcast %209 : i32 to vector<16x1xi32>
    %211 = arith.select %206, %210, %204 : vector<16x1xi1>, vector<16x1xi32>
    %c3_i32_43 = arith.constant 3 : i32
    %212 = vector.broadcast %c3_i32_43 : i32 to vector<16x1xi32>
    %213 = arith.cmpi eq, %167, %212 : vector<16x1xi32>
    %214 = arith.index_cast %arg0 : i32 to index
    %c1_44 = arith.constant 1 : index
    %215 = memref.load %arg2[%214, %c1_44] : memref<3x2xi32, #tpu.memory_space<smem>>
    %c8_i32_45 = arith.constant 8 : i32
    %216 = arith.addi %c8_i32_45, %215 : i32
    %217 = vector.broadcast %216 : i32 to vector<16x1xi32>
    %218 = arith.select %213, %217, %211 : vector<16x1xi1>, vector<16x1xi32>
    %c11_i32_46 = arith.constant 11 : i32
    %219 = vector.broadcast %c11_i32_46 : i32 to vector<16x1xi32>
    %220 = arith.cmpi eq, %167, %219 : vector<16x1xi32>
    %221 = arith.index_cast %arg0 : i32 to index
    %c1_47 = arith.constant 1 : index
    %222 = memref.load %arg3[%221, %c1_47] : memref<3x2xi32, #tpu.memory_space<smem>>
    %c8_i32_48 = arith.constant 8 : i32
    %223 = arith.addi %c8_i32_48, %222 : i32
    %224 = vector.broadcast %223 : i32 to vector<16x1xi32>
    %225 = arith.select %220, %224, %218 : vector<16x1xi1>, vector<16x1xi32>
    %226 = vector.broadcast %225 : vector<16x1xi32> to vector<16x16xi32>
    %227 = arith.cmpi eq, %168, %226 : vector<16x16xi32>
    %228 = arith.extui %227 : vector<16x16xi1> to vector<16x16xi32>
    %229 = arith.sitofp %228 : vector<16x16xi32> to vector<16x16xf32>
    %cst_49 = arith.constant dense<0.000000e+00> : vector<16x32xf32>
    %230 = tpu.matmul %229, %105, %cst_49 {dimension_numbers = #tpu.dot_dimension_numbers<[1], [0], [0], [1], [0, 0, 1, 1], [], []>} : vector<16x16xf32>, vector<16x32xf32>, vector<16x32xf32> -> vector<16x32xf32>
    %231 = vector.extract_strided_slice %230 {offsets = [0, 0], sizes = [8, 32], strides = [1, 1]} : vector<16x32xf32> to vector<8x32xf32>
    %232 = vector.extract_strided_slice %230 {offsets = [8, 0], sizes = [8, 32], strides = [1, 1]} : vector<16x32xf32> to vector<8x32xf32>
    %233 = arith.mulf %231, %232 : vector<8x32xf32>
    %cst_50 = arith.constant dense<0.000000e+00> : vector<8xf32>
    %234 = vector.multi_reduction <add>, %233, %cst_50 [1] : vector<8x32xf32> to vector<8xf32>
    %235 = vector.shape_cast %234 : vector<8xf32> to vector<8x1xf32>
    %236 = arith.mulf %231, %231 : vector<8x32xf32>
    %cst_51 = arith.constant dense<0.000000e+00> : vector<8xf32>
    %237 = vector.multi_reduction <add>, %236, %cst_51 [1] : vector<8x32xf32> to vector<8xf32>
    %238 = vector.shape_cast %237 : vector<8xf32> to vector<8x1xf32>
    %239 = arith.mulf %232, %232 : vector<8x32xf32>
    %cst_52 = arith.constant dense<0.000000e+00> : vector<8xf32>
    %240 = vector.multi_reduction <add>, %239, %cst_52 [1] : vector<8x32xf32> to vector<8xf32>
    %241 = vector.shape_cast %240 : vector<8xf32> to vector<8x1xf32>
    %cst_53 = arith.constant 1.000000e-16 : f32
    %242 = vector.broadcast %cst_53 : f32 to vector<8x1xf32>
    %243 = arith.maximumf %238, %242 : vector<8x1xf32>
    %cst_54 = arith.constant 1.000000e-16 : f32
    %244 = vector.broadcast %cst_54 : f32 to vector<8x1xf32>
    %245 = arith.maximumf %241, %244 : vector<8x1xf32>
    %246 = arith.mulf %243, %245 : vector<8x1xf32>
    %247 = math.rsqrt %246 : vector<8x1xf32>
    %248 = arith.mulf %235, %247 : vector<8x1xf32>
    %249 = vector.broadcast %166 : vector<1x1xf32> to vector<8x1xf32>
    %250 = arith.addf %248, %249 : vector<8x1xf32>
    %cst_55 = arith.constant 5.000000e-01 : f32
    %251 = vector.broadcast %cst_55 : f32 to vector<8x1xf32>
    %252 = arith.mulf %250, %251 : vector<8x1xf32>
    %253 = vector.shape_cast %252 : vector<8x1xf32> to vector<8x1xf32>
    %254 = vector.broadcast %253 : vector<8x1xf32> to vector<8x128xf32>
    %c0_56 = arith.constant 0 : index
    %c0_57 = arith.constant 0 : index
    %255 = vector.load %arg8[%c0_56, %c0_57] : memref<8x128xf32, #tpu.memory_space<vmem>>, vector<8x128xf32>
    tpu.vector_store %arg8[%c0_56, %c0_57], %254 {strides = array<i32>} : memref<8x128xf32, #tpu.memory_space<vmem>>, vector<8x128xf32>,
    return
  }
  func.func @transform_0(%arg0: i32, %arg1: memref<3x16xi32, #tpu.memory_space<smem>>, %arg2: memref<3x2xi32, #tpu.memory_space<smem>>, %arg3: memref<3x2xi32, #tpu.memory_space<smem>>, %arg4: memref<3x2xi32, #tpu.memory_space<smem>>, %arg5: memref<3x2xi32, #tpu.memory_space<smem>>) -> (i32, i32) {
    %c0_i32 = arith.constant 0 : i32
    %c0_i32_0 = arith.constant 0 : i32
    %c0_i32_1 = arith.constant 0 : i32
    return %c0_i32, %c0_i32_0 : i32, i32
  }
  func.func @transform_1(%arg0: i32, %arg1: memref<3x16xi32, #tpu.memory_space<smem>>, %arg2: memref<3x2xi32, #tpu.memory_space<smem>>, %arg3: memref<3x2xi32, #tpu.memory_space<smem>>, %arg4: memref<3x2xi32, #tpu.memory_space<smem>>, %arg5: memref<3x2xi32, #tpu.memory_space<smem>>) -> (i32, i32) {
    %c0_i32 = arith.constant 0 : i32
    %c0_i32_0 = arith.constant 0 : i32
    %c0_i32_1 = arith.constant 0 : i32
    return %c0_i32, %c0_i32_0 : i32, i32
  }
  func.func @transform_2(%arg0: i32, %arg1: memref<3x16xi32, #tpu.memory_space<smem>>, %arg2: memref<3x2xi32, #tpu.memory_space<smem>>, %arg3: memref<3x2xi32, #tpu.memory_space<smem>>, %arg4: memref<3x2xi32, #tpu.memory_space<smem>>, %arg5: memref<3x2xi32, #tpu.memory_space<smem>>) -> (i32, i32) {
    %c0_i32 = arith.constant 0 : i32
    %c0_i32_0 = arith.constant 0 : i32
    return %arg0, %c0_i32 : i32, i32
  }
}

</mosaic_0001>

<bundles_post_ra>
// kernel: tpu_custom_call.1
= control target key start
LH: loop header
LB: loop body
LE: loop exit
PB: predicated region body
PF: predicated region fallthrough
CT: control target
= control target key end

     0   :  { %s1460_s0 = inlined_call_operand.vmem [shape: s32[3,16], index: 0, kind: input, shape index: {}]   ;;  %s1461_s5 = inlined_call_operand.vmem [shape: f32[128,32], index: 5, kind: input, shape index: {}]   ;;  %s1462_s6 = inlined_call_operand.vmem [shape: f32[32,128], index: 6, kind: input, shape index: {}]   ;;  %s1463_s7 = inlined_call_operand.hbm [shape: f32[24,128], index: 7, kind: output, shape index: {}]   ;;  %s1464_s1 = inlined_call_operand.vmem [shape: s32[3,2], index: 1, kind: input, shape index: {}]   ;;  %s1465_s2 = inlined_call_operand.vmem [shape: s32[3,2], index: 2, kind: input, shape index: {}]   ;;  %s1466_s3 = inlined_call_operand.vmem [shape: s32[3,2], index: 3, kind: input, shape index: {}]   ;;  %s1467_s4 = inlined_call_operand.vmem [shape: s32[3,2], index: 4, kind: input, shape index: {}]  }
   0x1   :  { %s12_s26 = sshll.u32 %s1460_s0, 4  ;;  %s16_s29 = sshll.u32 %s1464_s1, 4  ;;  %s13_s26 = int_to_ptr.vmem [resolvable:$true] %s12_s26  ;;  %s17_s29 = int_to_ptr.vmem [resolvable:$true] %s16_s29 }
   0x2   :  { %s963_s30 = scalar_lea.vmem %s13_s26, 64  ;;  %p968_p1 = scmp.lt.s32.totalorder %s13_s26, %s13_s26 }
   0x3   :  { %p964_p0 = scmp.ne.s32.totalorder %s13_s26, %s963_s30  ;;  %p969_p2 = scmp.lt.s32.totalorder %s963_s30, %s963_s30 }
   0x5   :  { %p970_p3 = por %p969_p2, %p968_p1 }
   0x7   :  { %p971_p4 = pnand %p970_p3, %p964_p0 }
   0x9   :  { %974 = shalt.err (!%p971_p4)  }
   0xa   :  { %s1089_s8 = smov [#allocation3]   ;;  %s975_s9 = scalar_lea.vmem %s17_s29, 64 }
   0xb   :  { %15 = dma.vmem_to_smem %s13_s26, 64, %s1089_s8, [#allocation2] }
   0xc   :  { %p976_p5 = scmp.ne.s32.totalorder %s17_s29, %s975_s9  ;;  %p980_p6 = scmp.lt.s32.totalorder %s17_s29, %s17_s29 }
   0xd   :  { %p981_p7 = scmp.lt.s32.totalorder %s975_s9, %s975_s9 }
   0xf   :  { %p982_p8 = por %p981_p7, %p980_p6 }
  0x11   :  { %p983_p9 = pnand %p982_p8, %p976_p5 }
  0x13   :  { %986 = shalt.err (!%p983_p9)  }
  0x14   :  { %s1090_s0 = smov [#allocation4]   ;;  %s20_s11 = sshll.u32 %s1465_s2, 4  ;;  %s21_s11 = int_to_ptr.vmem [resolvable:$true] %s20_s11 }
  0x15   :  { %19 = dma.vmem_to_smem %s17_s29, 64, %s1090_s0, [#allocation2] }
  0x16   :  { %s24_s14 = sshll.u32 %s1466_s3, 4  ;;  %s987_s15 = scalar_lea.vmem %s21_s11, 64  ;;  %s25_s14 = int_to_ptr.vmem [resolvable:$true] %s24_s14 }
  0x17   :  { %p988_p10 = scmp.ne.s32.totalorder %s21_s11, %s987_s15  ;;  %p992_p11 = scmp.lt.s32.totalorder %s21_s11, %s21_s11 }
  0x18   :  { %p993_p12 = scmp.lt.s32.totalorder %s987_s15, %s987_s15 }
  0x1a   :  { %p994_p13 = por %p993_p12, %p992_p11 }
  0x1c   :  { %p995_p0 = pnand %p994_p13, %p988_p10 }
  0x1e   :  { %998 = shalt.err (!%p995_p0)  }
  0x1f   :  { %s1091_s16 = smov [#allocation5]   ;;  %s999_s17 = scalar_lea.vmem %s25_s14, 64 }
  0x20   :  { %23 = dma.vmem_to_smem %s21_s11, 64, %s1091_s16, [#allocation2] }
  0x21   :  { %p1000_p1 = scmp.ne.s32.totalorder %s25_s14, %s999_s17  ;;  %p1004_p2 = scmp.lt.s32.totalorder %s25_s14, %s25_s14 }
  0x22   :  { %p1005_p3 = scmp.lt.s32.totalorder %s999_s17, %s999_s17 }
  0x24   :  { %p1006_p4 = por %p1005_p3, %p1004_p2 }
  0x26   :  { %p1007_p5 = pnand %p1006_p4, %p1000_p1 }
  0x28   :  { %1010 = shalt.err (!%p1007_p5)  }
  0x29   :  { %s1092_s2 = smov [#allocation6]   ;;  %s28_s19 = sshll.u32 %s1467_s4, 4  ;;  %s29_s19 = int_to_ptr.vmem [resolvable:$true] %s28_s19 }
  0x2a   :  { %27 = dma.vmem_to_smem %s25_s14, 64, %s1092_s2, [#allocation2] }
  0x2b   :  { %s1011_s20 = scalar_lea.vmem %s29_s19, 64  ;;  %p1016_p7 = scmp.lt.s32.totalorder %s29_s19, %s29_s19 }
  0x2c   :  { %p1012_p6 = scmp.ne.s32.totalorder %s29_s19, %s1011_s20  ;;  %p1017_p8 = scmp.lt.s32.totalorder %s1011_s20, %s1011_s20 }
  0x2e   :  { %p1018_p9 = por %p1017_p8, %p1016_p7 }
  0x30   :  { %p1019_p10 = pnand %p1018_p9, %p1012_p6 }
  0x32   :  { %1022 = shalt.err (!%p1019_p10)  }
  0x33   :  { %s1093_s21 = smov [#allocation7]  }
  0x34   :  { %31 = dma.vmem_to_smem %s29_s19, 64, %s1093_s21, [#allocation2] }
  0x35   :  { %1067 = dma.done.wait [#allocation2], 320 }
  0x36   :  { %1068 = vsyncadd [#allocation2], 4294966976 }
  0x37   :  { %33 = sfence }
  0x38   :  { %34 = vsyncpa [#allocation9], 0 }
  0x39   :  { %36 = vsyncpa [#allocation9 + $0x1], 0  ;;  %s1152_s22 = smov 0   ;;  %s1154_s23 = smov 0  }
  0x3a   :  { %s1156_s4 = smov 0   ;;  %s1158_s24 = smov 0  }
  0x3b LB: > { %s746_s25 = sadd.s32 4294967295, %s1087_s24   ;;  %s747_s26 = sadd.s32 4294967294, %s1087_s24   ;;  %s1087_s24 = sphi %s1158_s24, %s1473_s24   ;;  %s1083_s4 = sphi %s1156_s4, %s1472_s4   ;;  %s1079_s23 = sphi %s1154_s23, %s1471_s23   ;;  %s1075_s22 = sphi %s1152_s22, %s1470_s22  }
  0x3c   : > { %s1175_s27 = sadd.s32 1, %s1087_s24   ;;  %s91_s28 = sadd.s32 1, %s1083_s4 }
  0x3d   : > { %s88_s29 = ssub.s32 %s1087_s24, %s1175_s27  ;;  %p101_p11 = scmp.ne.s32.totalorder %s1083_s4, %s1079_s23 }
  0x3e   : > { %p89_p12 = scmp.eq.s32.totalorder %s88_s29, 0  ;;  %p102_p13 = scmp.eq.s32.totalorder %s746_s25, 2 }
  0x3f   : > { %p107_p0 = scmp.ne.s32.totalorder %s1079_s23, %s1075_s22  ;;  %p108_p1 = scmp.eq.s32.totalorder %s747_s26, 2 }
  0x40   : > { %s1185_s30 = scalar_select %p89_p12, %s1083_s4, %s91_s28  }
  0x41   : > { %p1187_p2 = por %p102_p13, %p101_p11  ;;  %p1191_p3 = por %p108_p1, %p107_p0 }
  0x42   : > { %p749_p4 = scmp.ge.s32.totalorder %s1087_s24, 1  ;;  %p132_p5 = scmp.lt.s32.totalorder %s1087_s24, 4 }
  0x44   : > { %p133_p6 = pnand %p749_p4, %p132_p5 }
  0x45   : > { %v272_v0 = vld [vmem:[%s1461_s5] sm:$0xff] (!%p133_p6)  ;;  %v273_v1 = vld [vmem:[%s1461_s5 + $0x8] sm:$0xff] (!%p133_p6)  ;;  %v274_v2 = vld [vmem:[%s1461_s5 + $0x10] sm:$0xff] (!%p133_p6)  ;;  %v149_v3 = vlaneseq (!%p133_p6)  ;;  %s1206_s14 = sshll.u32 (!%p133_p6), %s746_s25, 7  ;;  %v1094_v43 = vmov (!%p133_p6), 1.0  }
  0x46   : > { %136 = sbr.rel (%p133_p6) target bundleno = 914 (0x392), region = 28  ;;  %v851_v4 = vpack.c.bf16 (!%p133_p6), %v273_v1, %v272_v0  ;;  %v275_v5 = vld [vmem:[%s1461_s5 + $0x18] sm:$0xff] (!%p133_p6)  ;;  %s155_s17 = sld [smem:[#allocation3 + %s1206_s14]] (!%p133_p6)  ;;  %v276_v7 = vld [vmem:[%s1461_s5 + $0x20] sm:$0xff] (!%p133_p6)  ;;  %v277_v8 = vld [vmem:[%s1461_s5 + $0x28] sm:$0xff] (!%p133_p6) }
  0x47   : > { %s1213_s2 = sadd.s32 (!%p133_p6), 1, %s1206_s14  ;;  %v855_v6 = vpack.c.bf16 (!%p133_p6), %v275_v5, %v274_v2  ;;  %v1222_v9 = vshrl.u32 (!%p133_p6), %v149_v3, 7  ;;  %s168_s25 = sadd.s32 (!%p133_p6), 2, %s1206_s14  ;;  %v859_v10 = vpack.c.bf16 (!%p133_p6), %v277_v8, %v276_v7  ;;  %v278_v11 = vld [vmem:[%s1461_s5 + $0x30] sm:$0xff] (!%p133_p6)  ;;  %v279_v12 = vld [vmem:[%s1461_s5 + $0x38] sm:$0xff] (!%p133_p6)  ;;  %v280_v19 = vld [vmem:[%s1461_s5 + $0x40] sm:$0xff] (!%p133_p6) }
  0x48   : > { %s162_s21 = sld [smem:[#allocation3 + %s1213_s2]] (!%p133_p6)  ;;  %852 = vmatprep.subr.bf16.mxu0 (!%p133_p6), %v851_v4  ;;  %s175_s28 = sadd.s32 (!%p133_p6), 3, %s1206_s14  ;;  %v863_v16 = vpack.c.bf16 (!%p133_p6), %v279_v12, %v278_v11  ;;  %v281_v20 = vld [vmem:[%s1461_s5 + $0x48] sm:$0xff] (!%p133_p6)  ;;  %v1293_v29 = vand.u32 (!%p133_p6), 127, %v149_v3  ;;  %v282_v30 = vld [vmem:[%s1461_s5 + $0x50] sm:$0xff] (!%p133_p6)  ;;  %v283_v31 = vld [vmem:[%s1461_s5 + $0x58] sm:$0xff] (!%p133_p6) }
  0x49   : > { %s1226_s26 = sld [smem:[#allocation3 + %s168_s25]] (!%p133_p6)  ;;  %854 = vmatpush3.bf16.msra.mxu0 (!%p133_p6), %v851_v4  ;;  %vm152_vm0 = vcmp.eq.s32.totalorder (!%p133_p6), %v1222_v9, 0  ;;  %s182_s0 = sadd.s32 (!%p133_p6), 4, %s1206_s14  ;;  %vm159_vm1 = vcmp.eq.s32.totalorder (!%p133_p6), %v1222_v9, 1  ;;  %vm166_vm2 = vcmp.eq.s32.totalorder (!%p133_p6), %v1222_v9, 2  ;;  %vm173_vm3 = vcmp.eq.s32.totalorder (!%p133_p6), %v1222_v9, 3 }
  0x4a   : > { %s1229_s29 = sld [smem:[#allocation3 + %s175_s28]] (!%p133_p6)  ;;  %856 = vmatprep.subr.bf16.mxu0 (!%p133_p6), %v855_v6  ;;  %s189_s1 = sadd.s32 (!%p133_p6), 5, %s1206_s14  ;;  %vm180_vm4 = vcmp.eq.s32.totalorder (!%p133_p6), %v1222_v9, 4  ;;  %v1271_v23 = vadd.s32 (!%p133_p6), 8, %v1222_v9  ;;  %vm187_vm5 = vcmp.eq.s32.totalorder (!%p133_p6), %v1222_v9, 5  ;;  %vm194_vm6 = vcmp.eq.s32.totalorder (!%p133_p6), %v1222_v9, 6 }
  0x4b   : > { %s1241_s15 = sld [smem:[#allocation3 + %s182_s0]] (!%p133_p6)  ;;  %s196_s3 = sadd.s32 (!%p133_p6), 6, %s1206_s14  ;;  %v867_v27 = vpack.c.bf16 (!%p133_p6), %v281_v20, %v280_v19  ;;  %vm201_vm7 = vcmp.eq.s32.totalorder (!%p133_p6), %v1222_v9, 7  ;;  %v871_v39 = vpack.c.bf16 (!%p133_p6), %v283_v31, %v282_v30  ;;  %v284_v41 = vld [vmem:[%s1461_s5 + $0x60] sm:$0xff] (!%p133_p6)  ;;  %v285_v42 = vld [vmem:[%s1461_s5 + $0x68] sm:$0xff] (!%p133_p6)  ;;  %v286_v53 = vld [vmem:[%s1461_s5 + $0x70] sm:$0xff] (!%p133_p6) }
  0x4c   : > { %s1243_s16 = sld [smem:[#allocation3 + %s189_s1]] (!%p133_p6)  ;;  %v156_v13 = vstv (!%p133_p6), %s155_s17  ;;  %s203_s18 = sadd.s32 (!%p133_p6), 7, %s1206_s14  ;;  %vm209_vm8 = vcmp.eq.s32.totalorder (!%p133_p6), %v1271_v23, 8  ;;  %vm216_vm9 = vcmp.eq.s32.totalorder (!%p133_p6), %v1271_v23, 9  ;;  %vm223_vm10 = vcmp.eq.s32.totalorder (!%p133_p6), %v1271_v23, 10  ;;  %v287_v54 = vld [vmem:[%s1461_s5 + $0x78] sm:$0xff] (!%p133_p6) }
  0x4d   : > { %858 = vmatpush3.bf16.msra.mxu0 %v855_v6  ;;  %v157_v14 = vsel %vm152_vm0, %v156_v13, 0  ;;  %s1251_s19 = sld [smem:[#allocation3 + %s196_s3]]  ;;  %s210_s17 = sadd.s32 8, %s1206_s14  ;;  %vm230_vm12 = vcmp.eq.s32.totalorder %v1271_v23, 11  ;;  %vm237_vm13 = vcmp.eq.s32.totalorder %v1271_v23, 12  ;;  %vm244_vm14 = vcmp.eq.s32.totalorder %v1271_v23, 13 }
  0x4e   : > { %v163_v15 = vstv %s162_s21  ;;  %s1253_s20 = sld [smem:[#allocation3 + %s203_s18]]  ;;  %860 = vmatprep.subr.bf16.mxu0 %v859_v10  ;;  %s217_s25 = sadd.s32 9, %s1206_s14  ;;  %v875_v51 = vpack.c.bf16 %v285_v42, %v284_v41  ;;  %vm251_vm15 = vcmp.eq.s32.totalorder %v1271_v23, 14  ;;  %v879_v57 = vpack.c.bf16 %v287_v54, %v286_v53  ;;  %v365_v61 = vld [vmem:[%s1462_s6] sm:$0xff]  ;;  %v366_v62 = vld [vmem:[%s1462_s6 + $0x8] sm:$0xff]  ;;  %v367_v63 = vld [vmem:[%s1462_s6 + $0x10] sm:$0xff] }
  0x4f   : > { %v164_v17 = vsel %vm159_vm1, %v163_v15, %v157_v14  ;;  %v170_v18 = vstv %s1226_s26  ;;  %s1273_s26 = sld [smem:[#allocation3 + %s210_s17]]  ;;  %s224_s11 = sadd.s32 10, %s1206_s14  ;;  %v883_v0 = vpack.c.bf16 %v366_v62, %v365_v61  ;;  %v368_v1 = vld [vmem:[%s1462_s6 + $0x18] sm:$0xff] }
  0x50   : > { %v171_v21 = vsel %vm166_vm2, %v170_v18, %v164_v17  ;;  %v177_v22 = vstv %s1229_s29  ;;  %s1275_s10 = sld [smem:[#allocation3 + %s217_s25]]  ;;  %s231_s12 = sadd.s32 11, %s1206_s14  ;;  %v887_v2 = vpack.c.bf16 %v368_v1, %v367_v63 }
  0x51   : > { %v178_v24 = vsel %vm173_vm3, %v177_v22, %v171_v21  ;;  %862 = vmatpush3.bf16.msra.mxu0 %v859_v10  ;;  %v184_v25 = vstv %s1241_s15  ;;  %s1285_s29 = sld [smem:[#allocation3 + %s224_s11]]  ;;  %s238_s15 = sadd.s32 12, %s1206_s14  ;;  %884 = vmatprep.subr.bf16.mxu1 %v883_v0 }
  0x52   : > { %v191_v26 = vstv %s1243_s16  ;;  %s1287_s13 = sld [smem:[#allocation3 + %s231_s12]]  ;;  %864 = vmatprep.subr.bf16.mxu0 %v863_v16  ;;  %v185_v28 = vsel %vm180_vm4, %v184_v25, %v178_v24  ;;  %s245_s16 = sadd.s32 13, %s1206_s14  ;;  %vm258_vm4 = vcmp.eq.s32.totalorder %v1271_v23, 15  ;;  %886 = vmatpush3.bf16.msra.mxu1 %v883_v0  ;;  %v1095_v25 = vmov 0.0  }
  0x53   : > { %v192_v32 = vsel %vm187_vm5, %v191_v26, %v185_v28  ;;  %v198_v33 = vstv %s1251_s19  ;;  %s1308_s28 = sld [smem:[#allocation3 + %s238_s15]]  ;;  %s252_s0 = sadd.s32 14, %s1206_s14  ;;  %888 = vmatprep.subr.bf16.mxu1 %v887_v2 }
  0x54   : > { %v205_v34 = vstv %s1253_s20  ;;  %s1310_s21 = sld [smem:[#allocation3 + %s245_s16]]  ;;  %v199_v35 = vsel %vm194_vm6, %v198_v33, %v192_v32  ;;  %s259_s1 = sadd.s32 15, %s1206_s14 }
  0x55   : > { %866 = vmatpush3.bf16.msra.mxu0 %v863_v16  ;;  %v206_v36 = vsel %vm201_vm7, %v205_v34, %v199_v35  ;;  %v212_v37 = vstv %s1273_s26  ;;  %s1322_s19 = sld [smem:[#allocation3 + %s252_s0]] }
  0x56   : > { %v219_v38 = vstv %s1275_s10  ;;  %868 = vmatprep.subr.bf16.mxu0 %v867_v27  ;;  %vm266_vm11 = vcmp.eq.s32.totalorder %v1293_v29, %v206_v36  ;;  %v214_v40 = vsel %vm209_vm8, %v212_v37, 0  ;;  %s260_s12 = sld [smem:[#allocation3 + %s259_s1]]  ;;  %890 = vmatpush3.bf16.msra.mxu1 %v887_v2 }
  0x57   : > { %830 = vmatprep.mubr.msk.f32.mxu0 %vm266_vm11, %v1094_v43  ;;  %v221_v44 = vsel %vm216_vm9, %v219_v38, %v214_v40  ;;  %v226_v45 = vstv %s1285_s29  ;;  %s554_s20 = sld [smem:[#allocation4 + %s1213_s2]] }
  0x58   : > { %v233_v46 = vstv %s1287_s13  ;;  %v228_v47 = vsel %vm223_vm10, %v226_v45, %v221_v44  ;;  %s550_s11 = sld [smem:[#allocation5 + %s1206_s14]] }
  0x59   : > { %870 = vmatpush3.bf16.msra.mxu0 %v867_v27  ;;  %v235_v48 = vsel %vm230_vm12, %v233_v46, %v228_v47  ;;  %v240_v49 = vstv %s1308_s28  ;;  %s558_s26 = sld [smem:[#allocation5 + %s1213_s2]] }
  0x5a   : > { %v247_v50 = vstv %s1310_s21  ;;  %872 = vmatprep.subr.bf16.mxu0 %v871_v39  ;;  %v242_v52 = vsel %vm237_vm13, %v240_v49, %v235_v48  ;;  %s507_s15 = sld [smem:[#allocation6 + %s1213_s2]] }
  0x5b   : > { %v249_v55 = vsel %vm244_vm14, %v247_v50, %v242_v52  ;;  %v254_v56 = vstv %s1322_s19  ;;  %s546_s19 = sld [smem:[#allocation4 + %s1206_s14]] }
  0x5c   : > { %v256_v58 = vsel %vm251_vm15, %v254_v56, %v249_v55  ;;  %v261_v59 = vstv %s260_s12  ;;  %s509_s16 = sld [smem:[#allocation7 + %s1213_s2]]  ;;  %s146_s2 = sand.u32 1, %s1079_s23  }
  0x5d   : > { %874 = vmatpush3.bf16.msra.mxu0 %v871_v39  ;;  %v263_v60 = vsel %vm258_vm4, %v261_v59, %v256_v58  ;;  %v555_v5 = vstv %s554_s20  ;;  %s570_s12 = sadd.s32 8, %s554_s20  ;;  %s471_s3 = sld [smem:[#allocation6 + %s1206_s14]] }
  0x5e   : > { %876 = vmatprep.subr.bf16.mxu0 %v875_v51  ;;  %vm267_vm5 = vcmp.eq.s32.totalorder %v1293_v29, %v263_v60  ;;  %v551_v6 = vstv %s550_s11  ;;  %s566_s29 = sadd.s32 8, %s550_s11  ;;  %v571_v15 = vstv %s570_s12  ;;  %s472_s18 = sld [smem:[#allocation7 + %s1206_s14]] }
  0x5f   : > { %v553_v12 = vsel %vm209_vm8, %v551_v6, 4294967295  ;;  %v559_v13 = vstv %s558_s26  ;;  %v567_v17 = vstv %s566_s29  ;;  %s574_s13 = sadd.s32 8, %s558_s26  ;;  %s750_s28 = sshll.u32 %s146_s2, 3 }
  0x60   : > { %v561_v16 = vsel %vm216_vm9, %v559_v13, %v553_v12  ;;  %v575_v20 = vstv %s574_s13  ;;  %s508_s17 = sadd.s32 8, %s507_s15  ;;  %s148_s21 = scalar_lea.vmem [#allocation8], %s750_s28 }
  0x61   : > { %878 = vmatpush3.bf16.msra.mxu0 %v875_v51  ;;  %v547_v3 = vstv %s546_s19  ;;  %s562_s10 = sadd.s32 8, %s546_s19  ;;  %v569_v19 = vsel %vm223_vm10, %v567_v17, %v561_v16  ;;  %v511_v49 = vstv %s508_s17  ;;  %s700_s0 = sshll.u32 %s148_s21, 4  ;;  %s1420_s0 = int_to_ptr.vmem [resolvable:$true] %s700_s0 }
  0x62   : > { %880 = vmatprep.subr.bf16.mxu0 %v879_v57  ;;  %v548_v4 = vsel %vm152_vm0, %v547_v3, 4294967295  ;;  %v563_v10 = vstv %s562_s10  ;;  %v577_v21 = vsel %vm230_vm12, %v575_v20, %v569_v19  ;;  %s510_s25 = sadd.s32 8, %s509_s16  ;;  %vm512_vm8 = vcmp.ge.s32.totalorder %v1222_v9, %v511_v49  ;;  %s1418_s20 = scalar_lea.hbm %s1463_s7, %s1206_s14 }
  0x63   : > { %v556_v8 = vsel %vm159_vm1, %v555_v5, %v548_v4  ;;  %vm369_vm1 = vcmask 261120   ;;  %v473_v47 = vstv %s471_s3  ;;  %v514_v50 = vstv %s510_s25  ;;  %s687_s11 = scalar_lea.sflag [#allocation9], %s146_s2  ;;  %s1023_s26 = scalar_lea.vmem %s1420_s0, 128 }
  0x64   : > { %v564_v14 = vsel %vm166_vm2, %v563_v10, %v556_v8  ;;  %vm584_vm2 = vcmask 130048   ;;  %v476_v48 = vstv %s472_s18  ;;  %vm474_vm6 = vcmp.ge.s32.totalorder %v1222_v9, %v473_v47  ;;  %p1024_p7 = scmp.ne.s32.totalorder %s1420_s0, %s1023_s26  ;;  %s1096_s10 = smov [#allocation8]  }
  0x65   : > { %882 = vmatpush3.bf16.msra.mxu0 %v879_v57  ;;  %v572_v18 = vsel %vm173_vm3, %v571_v15, %v564_v14  ;;  %vm579_vm3 = vcmp.eq.s32.totalorder %v1293_v29, %v577_v21  ;;  %vm477_vm7 = vcmp.lt.s32.totalorder %v1222_v9, %v476_v48  ;;  %vm515_vm9 = vcmp.lt.s32.totalorder %v1222_v9, %v514_v50  ;;  %s1027_s12 = sshll.u32 %s1096_s10, 4  ;;  %s1028_s12 = int_to_ptr.vmem [resolvable:$false] %s1027_s12 }
  0x66   : > { %vm578_vm0 = vcmp.eq.s32.totalorder %v1293_v29, %v572_v18  ;;  %v763_v28 = vsel %vm579_vm3, 1.0, %v1095_v25  ;;  %vm475_vm10 = vcmp.ge.s32.totalorder %v1271_v23, %v473_v47  ;;  %vm478_vm11 = vcmp.lt.s32.totalorder %v1271_v23, %v476_v48  ;;  %vm479_vm12 = vmand %vm474_vm6, %vm477_vm7  ;;  %p1025_p8 = pnand %p1024_p7, %p1187_p2  ;;  %s1029_s29 = scalar_lea.vmem %s1028_s12, 256 }
  0x67   : > { %v762_v26 = vsel %vm578_vm0, 1.0, %v1095_v25  ;;  %vm513_vm13 = vcmp.ge.s32.totalorder %v1271_v23, %v511_v49  ;;  %vm516_vm14 = vcmp.lt.s32.totalorder %v1271_v23, %v514_v50  ;;  %vm517_vm15 = vmand %vm512_vm8, %vm515_vm9  ;;  %v758_v51 = vsel %vm479_vm12, 1.0, %v1095_v25  ;;  %p1030_p10 = scmp.lt.s32.totalorder %s1420_s0, %s1028_s12  ;;  %p1031_p11 = scmp.lt.s32.totalorder %s1029_s29, %s1023_s26 }
  0x68   : > { %831 = vmatmul.mubr.msk.f32.vlgmr.msra.gmra.mrb[0].mxu0 %vm267_vm5, %v1094_v43  ;;  %vm480_vm4 = vmand %vm475_vm10, %vm478_vm11  ;;  %v760_v53 = vsel %vm517_vm15, 1.0, %v1095_v25  ;;  %p1026_p9 = pneg %p1025_p8 }
  0x69   : > { %vm518_vm5 = vmand %vm513_vm13, %vm516_vm14  ;;  %v759_v52 = vsel %vm480_vm4, 1.0, %v1095_v25  ;;  %p1032_p12 = por %p1031_p11, %p1030_p10 }
  0x6a   : > { %v761_v9 = vsel %vm518_vm5, 1.0, %v1095_v25  ;;  %v485_v54 = vadd.f32 %v759_v52, %v758_v51 }
  0x6b   : > { %v523_v55 = vadd.f32 %v761_v9, %v760_v53  ;;  %p1033_p13 = pnand %p1032_p12, %p1026_p9 }
  0x6c   : > { %v486_v56 = vrot.slane %v485_v54, 4 }
  0x6d   : > { %v524_v57 = vrot.slane %v523_v55, 4 }
  0x6e   : > { %v487_v58 = vadd.f32 %v486_v56, %v485_v54 }
  0x6f   : > { %v525_v59 = vadd.f32 %v524_v57, %v523_v55 }
  0x70   : > { %v488_v23 = vrot.slane %v487_v58, 2 }
  0x71   : > { %v526_v61 = vrot.slane %v525_v59, 2 }
  0x72   : > { %v489_v63 = vadd.f32 %v488_v23, %v487_v58 }
  0x73   : > { %v527_v0 = vadd.f32 %v526_v61, %v525_v59 }
  0x74   : > { %v490_v1 = vrot.slane %v489_v63, 1 }
  0x75   : > { %v528_v3 = vrot.slane %v527_v0, 1 }
  0x76   : > { %v491_v5 = vadd.f32 %v490_v1, %v489_v63 }
 0x13b   : > { %v832_v7 = vpop.f32.mrb[0].mxu0 }
 0x13c   : > { %941 = vtanh.f32 %v832_v7  ;;  %v354_v11 = vpop.f32.mrb[1].mxu0  ;;  %v529_v7 = vadd.f32 %v528_v3, %v527_v0 }
 0x13d   : > { %943 = vtanh.f32 %v354_v11  ;;  %v492_v11 = vmax.f32 %v491_v5, 1.0 }
 0x13e   : > { %v530_v13 = vmax.f32 %v529_v7, 1.0 }
 0x146   : > { %v942_v22 = vpop.eup %941 }
 0x147   : > { %v944_v24 = vpop.eup %943 }
 0x148   : > { %841 = vmatprep.mubr.msk.f32.mxu1 %vm369_vm1, %v944_v24  ;;  %v891_v27 = vpack.c.bf16 %v942_v22, %v944_v24 }
 0x149   : > { %842 = vmatmul.mubr.msk.f32.vlgmr.msra.gmra.mrb[0].mxu1 %vm369_vm1, %v942_v22 }
 0x14a   : > { %892 = vmatprep.subr.bf16.mxu1 %v891_v27  ;;  %848 = vmatprep.mubr.msk.f32.mxu1 %vm584_vm2, %v762_v26 }
 0x14b   : > { %894 = vmatpush3.bf16.msra.mxu1 %v891_v27 }
 0x14e   : > { %849 = vmatmul.mubr.msk.f32.vlgmr.msra.gmra.mrb[2].mxu1 %vm584_vm2, %v763_v28 }
 0x21c   : > { %v843_v30 = vpop.f32.mrb[0].mxu1 }
 0x21d   : > { %v442_v31 = vpop.f32.mrb[1].mxu1 }
 0x21e   : > { %451 = vmax.xlane.f32.xlu0 %v442_v31 }
 0x221   : > { %v850_v32 = vpop.f32.mrb[2].mxu1 }
 0x222   : > { %453 = vmax.xlane.f32.xlu0 %v843_v30  ;;  %v657_v33 = vpop.f32.mrb[3].mxu1  ;;  %v674_v44 = vmul.f32 %v850_v32, %v850_v32 }
 0x223   : > { %v666_v34 = vmul.f32 %v850_v32, %v657_v33  ;;  %v670_v35 = vmul.f32 %v657_v33, %v657_v33 }
 0x224   : > { %v675_v46 = vsel %vm369_vm1, %v674_v44, 0.0 }
 0x225   : > { %v671_v36 = vsel %vm369_vm1, %v670_v35, 0.0  ;;  %v667_v29 = vsel %vm369_vm1, %v666_v34, 0.0 }
 0x226   : > { %672 = vadd.xlane.f32.xlu0 %v671_v36 }
 0x22a   : > { %668 = vadd.xlane.f32.xlu0 %v667_v29 }
 0x2ab   : > { %v452_v37 = vpop.xlane.xlu0 %451 }
 0x2ac   : > { %v455_v38 = vsub.f32 %v442_v31, %v452_v37 }
 0x2ae   : > { %v457_v39 = vmul.f32 1.442695, %v455_v38 }
 0x2af   : > { %v454_v40 = vpop.xlane.xlu0 %453 }
 0x2b0   : > { %945 = vpow2.f32 %v457_v39  ;;  %v456_v41 = vsub.f32 %v843_v30, %v454_v40 }
 0x2b2   : > { %v459_v42 = vmul.f32 1.442695, %v456_v41 }
 0x2b3   : > { %v673_v28 = vpop.xlane.xlu0 %672 }
 0x2b4   : > { %947 = vpow2.f32 %v459_v42  ;;  %v678_v33 = vmax.f32 %v673_v28, 1e-16 }
 0x2b7   : > { %v669_v47 = vpop.xlane.xlu0 %668 }
 0x2ba   : > { %v946_v43 = vpop.eup %945 }
 0x2bb   : > { %461 = vadd.xlane.f32.xlu1 %v946_v43 }
 0x2be   : > { %v948_v45 = vpop.eup %947 }
 0x2bf   : > { %463 = vadd.xlane.f32.xlu1 %v948_v45 }
 0x2c3   : > { %676 = vadd.xlane.f32.xlu1 %v675_v46 }
 0x348   : > { %v462_v60 = vpop.xlane.xlu1 %461 }
 0x349   : > { %949 = vlog2.f32 %v462_v60 }
 0x34c   : > { %v464_v62 = vpop.xlane.xlu1 %463 }
 0x34d   : > { %951 = vlog2.f32 %v464_v62 }
 0x34e   : > { %953 = vrcp.f32 %v492_v11 }
 0x34f   : > { %955 = vrcp.f32 %v530_v13 }
 0x350   : > { %v677_v27 = vpop.xlane.xlu1 %676 }
 0x351   : > { %v679_v32 = vmax.f32 %v677_v27, 1e-16 }
 0x353   : > { %v950_v2 = vpop.eup %949  ;;  %v680_v39 = vmul.f32 %v679_v32, %v678_v33 }
 0x354   : > { %v466_v4 = vmul.f32 0.6931472, %v950_v2 }
 0x355   : > { %957 = vrsqrt.f32 %v680_v39 }
 0x356   : > { %v469_v8 = vsub.f32 0.0, %v466_v4 }
 0x357   : > { %v952_v6 = vpop.eup %951 }
 0x358   : > { %v468_v10 = vmul.f32 0.6931472, %v952_v6  ;;  %v493_v14 = vmul.f32 %v758_v51, %v469_v8  ;;  %v531_v15 = vmul.f32 %v760_v53, %v469_v8  ;;  %v954_v34 = vpop.eup %953 }
 0x359   : > { %v956_v29 = vpop.eup %955 }
 0x35a   : > { %v470_v12 = vsub.f32 0.0, %v468_v10 }
 0x35c   : > { %v494_v16 = vmul.f32 %v759_v52, %v470_v12  ;;  %v532_v17 = vmul.f32 %v761_v9, %v470_v12 }
 0x35e   : > { %v495_v18 = vadd.f32 %v494_v16, %v493_v14  ;;  %v533_v19 = vadd.f32 %v532_v17, %v531_v15 }
 0x35f   : > { %v958_v44 = vpop.eup %957 }
 0x360   : > { %v496_v20 = vrot.slane %v495_v18, 4  ;;  %v534_v21 = vrot.slane %v533_v19, 4  ;;  %v682_v50 = vmul.f32 %v958_v44, %v669_v47 }
 0x362   : > { %v497_v22 = vadd.f32 %v496_v20, %v495_v18  ;;  %v535_v24 = vadd.f32 %v534_v21, %v533_v19 }
 0x364   : > { %v498_v25 = vrot.slane %v497_v22, 2  ;;  %v536_v26 = vrot.slane %v535_v24, 2 }
 0x366   : > { %v499_v30 = vadd.f32 %v498_v25, %v497_v22  ;;  %v537_v31 = vadd.f32 %v536_v26, %v535_v24 }
 0x368   : > { %v500_v35 = vrot.slane %v499_v30, 1  ;;  %v538_v36 = vrot.slane %v537_v31, 1 }
 0x36a   : > { %v501_v37 = vadd.f32 %v500_v35, %v499_v30  ;;  %v539_v38 = vadd.f32 %v538_v36, %v537_v31 }
 0x36c   : > { %v503_v40 = vmul.f32 %v954_v34, %v501_v37  ;;  %v541_v41 = vmul.f32 %v956_v29, %v539_v38 }
 0x36e   : > { %v504_v42 = vmul.f32 1.442695, %v503_v40  ;;  %v542_v43 = vmul.f32 1.442695, %v541_v41 }
 0x370   : > { %959 = vpow2.f32 %v504_v42 }
 0x371   : > { %961 = vpow2.f32 %v542_v43 }
 0x37a   : > { %v960_v45 = vpop.eup %959 }
 0x37b   : > { %v962_v46 = vpop.eup %961 }
 0x37c   : > { %v544_v48 = vadd.f32 %v962_v46, %v960_v45 }
 0x37e   : > { %v545_v49 = vmul.f32 0.5, %v544_v48 }
 0x380   : > { %v683_v51 = vadd.f32 %v682_v50, %v545_v49 }
 0x382   : > { %v684_v52 = vmul.f32 0.5, %v683_v51 }
 0x384   : > { %685 = vst [vmem:[%s148_s21] sm:$0xff] %v684_v52 }
 0x385   : > { %1036 = shalt.err (!%p1033_p13)
}
 0x386   : > { %s1037_s14 = scalar_lea.hbm %s1418_s20, 128  ;;  %s1041_s16 = scalar_lea.hbm %s1463_s7, 384 }
 0x387   : > { %p1038_p0 = scmp.ne.s32.totalorder %s1418_s20, %s1037_s14  ;;  %p1042_p5 = scmp.lt.u32.totalorder %s1418_s20, %s1463_s7 }
 0x388   : > { %p1043_p6 = scmp.lt.u32.totalorder %s1041_s16, %s1037_s14  ;;  %p1045_p8 = scmp.lt.u32.totalorder %s1037_s14, %s1418_s20 }
 0x389   : > { %p1039_p1 = pnand %p1038_p0, %p1187_p2 }
 0x38a   : > { %p1044_p7 = por %p1043_p6, %p1042_p5 }
 0x38b   : > { %p1040_p4 = pneg %p1039_p1 }
 0x38c   : > { %p1046_p9 = por %p1045_p8, %p1044_p7 }
 0x38e   : > { %p1047_p10 = pnand %p1046_p9, %p1040_p4 }
 0x390   : > { %1050 = shalt.err (!%p1047_p10)
}
 0x391   : > { %895 = dma.vmem_to_hbm [thread:$0]  (%p1187_p2), %s1420_s0, 128, %s1418_s20, %s687_s11  }
 0x392 PF: > { %p901_p11 = scmp.ge.s32.totalorder %s1087_s24, 2  ;;  %s712_s17 = sand.u32 1, %s1075_s22  }
 0x393   : > { %s713_s25 = scalar_lea.sflag [#allocation9], %s712_s17 }
 0x394   : > { %p898_p12 = pnand %p901_p11, %p1191_p3 }
 0x396   : > { %1070 = dma.done.wait (!%p898_p12), %s713_s25, 128  }
 0x397   : > { %1072 = vsyncadd (!%p898_p12), %s713_s25, 4294967168  ;;  %p39_p13 = scmp.ge.s32.totalorder %s1175_s27, 5   ;;  %s1470_s22 = smov %s1079_s23 }
 0x398   : > { %s1471_s23 = smov %s1083_s4  ;;  %s1472_s4 = smov %s1185_s30 }
 0x399   : > { %s1473_s24 = smov %s1175_s27  ;;  %41 = sbr.rel (!%p39_p13) target bundleno = 59 (0x3b), region = 60 }
 0x3a0   :  { %718 = vsyncpa [#allocation9], 1 }
 0x3a1   :  { %720 = vsyncpa [#allocation9 + $0x1], 1 }

</bundles_post_ra>
